<compile_context>
chip_gen: v7x
topology: tpu7x:2x2x1
jax: 0.10.0
libtpu: 0.0.40
codegen_flags: <defaults>
</compile_context>

<pallas_src>
import jax
import jax.numpy as jnp
from jax.experimental import pallas as pl
from jax.experimental.pallas import tpu as pltpu


def _round_up(n, m):
    return ((n + m - 1) // m) * m


# -----------------------------------------------------------------------------
# Pallas kernel: fused batchmul2d for one (region, batch) tile.
#   region 0 = top modes with weights1, region 1 = bottom modes with weights2.
# Complex numbers are carried as split real/imag f32.
# Shapes inside the kernel (region/batch dims squeezed away):
#   xr/xi : (Cin,  Mp)        spectral input slice
#   wr/wi : (Cin, Cout, Mp)   spectral weights
#   er/ei : (1,   Mp)         conditional embedding (broadcast over Cin)
#   or/oi : (Cout, Mp)        output
# -----------------------------------------------------------------------------
def _batchmul_kernel(xr_ref, xi_ref, wr_ref, wi_ref, er_ref, ei_ref,
                     or_ref, oi_ref):
    xr = xr_ref[...]
    xi = xi_ref[...]
    er = er_ref[...]
    ei = ei_ref[...]

    # input * emb (complex multiply, broadcast over input channels)
    ar = xr * er - xi * ei            # (Cin, Mp)
    ai = xr * ei + xi * er

    cin = xr_ref.shape[0]
    acc_r = jnp.zeros(or_ref.shape, jnp.float32)   # (Cout, Mp)
    acc_i = jnp.zeros(oi_ref.shape, jnp.float32)

    # FMA-accumulate over the input-channel axis: avoids materializing
    # (Cin, Cout, Mp) temporaries and the cross-sublane reduce; stays in the
    # VALU slots. (At Cin/Cout >= ~64 this should become an MXU dot_general.)
    for ci in range(cin):
        wr_c = wr_ref[ci]             # (Cout, Mp)
        wi_c = wi_ref[ci]
        ar_c = ar[ci:ci + 1, :]       # (1, Mp) -> broadcast over Cout
        ai_c = ai[ci:ci + 1, :]
        acc_r = acc_r + (ar_c * wr_c - ai_c * wi_c)
        acc_i = acc_i + (ar_c * wi_c + ai_c * wr_c)

    or_ref[...] = acc_r
    oi_ref[...] = acc_i


def batchmul2d_fused_pallas(x_top, x_bot, w1, w2, emb1, emb2):
    """
    x_top, x_bot : (B, Cin, m1, m2)   complex64   spectral input slices
    w1, w2       : (Cin, Cout, m1, m2) complex64  spectral weights
    emb1, emb2   : (B, m1, m2) complex64 or None  conditional embeddings
    returns (out_top, out_bot), each (B, Cout, m1, m2) complex64
    """
    B, Cin, m1, m2 = x_top.shape
    Cout = w1.shape[1]
    M = m1 * m2
    Mp = _round_up(M, 128)            # lane-dense mode axis
    pad = Mp - M

    x_c = jnp.stack([x_top, x_bot], axis=0)     # (2, B, Cin, m1, m2)
    w_c = jnp.stack([w1, w2], axis=0)           # (2, Cin, Cout, m1, m2)

    def split_pad(c, shape):
        r = jnp.real(c).reshape(shape).astype(jnp.float32)
        i = jnp.imag(c).reshape(shape).astype(jnp.float32)
        if pad:
            widths = [(0, 0)] * (len(shape) - 1) + [(0, pad)]
            r = jnp.pad(r, widths)
            i = jnp.pad(i, widths)
        return r, i

    xr, xi = split_pad(x_c, (2, B, Cin, M))          # (2, B, Cin, Mp)
    wr, wi = split_pad(w_c, (2, Cin, Cout, M))       # (2, Cin, Cout, Mp)

    if emb1 is None:
        er = jnp.ones((2, B, 1, Mp), jnp.float32)
        ei = jnp.zeros((2, B, 1, Mp), jnp.float32)
    else:
        e_c = jnp.stack([emb1, emb2], axis=0)        # (2, B, m1, m2)
        er, ei = split_pad(e_c, (2, B, 1, M))        # (2, B, 1, Mp)

    sq = pl.Squeezed()
    x_spec = pl.BlockSpec((sq, sq, Cin, Mp), lambda r, b: (r, b, 0, 0))
    w_spec = pl.BlockSpec((sq, Cin, Cout, Mp), lambda r, b: (r, 0, 0, 0))
    e_spec = pl.BlockSpec((sq, sq, 1, Mp), lambda r, b: (r, b, 0, 0))
    o_spec = pl.BlockSpec((sq, sq, Cout, Mp), lambda r, b: (r, b, 0, 0))

    out_r, out_i = pl.pallas_call(
        _batchmul_kernel,
        out_shape=(
            jax.ShapeDtypeStruct((2, B, Cout, Mp), jnp.float32),
            jax.ShapeDtypeStruct((2, B, Cout, Mp), jnp.float32),
        ),
        grid=(2, B),
        in_specs=[x_spec, x_spec, w_spec, w_spec, e_spec, e_spec],
        out_specs=(o_spec, o_spec),
        compiler_params=pltpu.CompilerParams(
            dimension_semantics=("parallel", "parallel")),
    )(xr, xi, wr, wi, er, ei)

    out_c = jax.lax.complex(out_r[..., :M], out_i[..., :M])
    out_c = out_c.reshape(2, B, Cout, m1, m2)
    return out_c[0], out_c[1]


# -----------------------------------------------------------------------------
# Full SpectralConv2d_cond forward
# -----------------------------------------------------------------------------
def spectral_conv2d_cond_forward(x, params, emb=None):
    """
    x:   (B, Cin, H, W)      float32  (NCHW, as in PyTorch)
    emb: (B, cond_channels)  float32 or None
    """
    B, Cin, H, W = x.shape
    m1 = params["modes1"]
    m2 = params["modes2"]
    Cout = params["weights1"].shape[1]

    if emb is not None:
        # FreqLinear: tiny dense matmul; kept in plain XLA (a pallas_call launch
        # would cost more than the FLOPs it performs).
        h = emb @ params["fl_weights"] + params["fl_bias"]
        h = h.reshape(B, m1, m2, 2, 2)
        # torch.view_as_complex consumes the LAST axis as (real, imag);
        # axis -2 selects emb1 / emb2.
        emb1 = jax.lax.complex(h[..., 0, 0], h[..., 0, 1])   # (B, m1, m2)
        emb2 = jax.lax.complex(h[..., 1, 0], h[..., 1, 1])
    else:
        emb1 = emb2 = None

    # TODO(synk): FFT / inverse FFT have no Pallas TPU equivalent -- kept in XLA.
    x_ft = jnp.fft.rfft2(x)                      # (B, Cin, H, W//2+1) complex64

    top = x_ft[:, :, :m1, :m2]
    bot = x_ft[:, :, H - m1:, :m2]

    out_top, out_bot = batchmul2d_fused_pallas(
        top, bot, params["weights1"], params["weights2"], emb1, emb2)

    out_ft = jnp.zeros((B, Cout, H, W // 2 + 1), dtype=jnp.complex64)
    out_ft = out_ft.at[:, :, :m1, :m2].set(out_top)
    out_ft = out_ft.at[:, :, H - m1:, :m2].set(out_bot)

    return jnp.fft.irfft2(out_ft, s=(H, W))      # (B, Cout, H, W) float32


# -----------------------------------------------------------------------------
# Pure-JAX reference (silent correctness check)
# -----------------------------------------------------------------------------
def _reference_forward(x, params, emb=None):
    B, Cin, H, W = x.shape
    m1, m2 = params["modes1"], params["modes2"]
    Cout = params["weights1"].shape[1]
    if emb is not None:
        h = emb @ params["fl_weights"] + params["fl_bias"]
        h = h.reshape(B, m1, m2, 2, 2)
        emb1 = h[..., 0, 0] + 1j * h[..., 0, 1]
        emb2 = h[..., 1, 0] + 1j * h[..., 1, 1]
    else:
        emb1 = emb2 = None

    def bm(inp, w, e):
        if e is not None:
            inp = inp * e[:, None, :, :]
        return jnp.einsum("bixy,ioxy->boxy", inp, w)

    x_ft = jnp.fft.rfft2(x)
    out_ft = jnp.zeros((B, Cout, H, W // 2 + 1), dtype=jnp.complex64)
    out_ft = out_ft.at[:, :, :m1, :m2].set(bm(x_ft[:, :, :m1, :m2],
                                              params["weights1"], emb1))
    out_ft = out_ft.at[:, :, H - m1:, :m2].set(bm(x_ft[:, :, -m1:, :m2],
                                                  params["weights2"], emb2))
    return jnp.fft.irfft2(out_ft, s=(H, W))


# -----------------------------------------------------------------------------
# Main
# -----------------------------------------------------------------------------
if __name__ == "__main__":
    B = 2
    in_channels = 4
    out_channels = 4
    H = W = 16
    modes1 = modes2 = 4
    cond_channels = 3

    key = jax.random.PRNGKey(0)
    keys = jax.random.split(key, 8)

    scale = 1.0 / (in_channels * out_channels)
    # torch.rand on a complex dtype -> uniform[0,1) real and imag parts
    w1 = scale * (jax.random.uniform(keys[0], (in_channels, out_channels, modes1, modes2))
                  + 1j * jax.random.uniform(keys[1], (in_channels, out_channels, modes1, modes2)))
    w2 = scale * (jax.random.uniform(keys[2], (in_channels, out_channels, modes1, modes2))
                  + 1j * jax.random.uniform(keys[3], (in_channels, out_channels, modes1, modes2)))

    fl_scale = 1.0 / (cond_channels + 4 * modes1 * modes2)
    fl_weights = fl_scale * jax.random.normal(
        keys[4], (cond_channels, 4 * modes1 * modes2), dtype=jnp.float32)
    fl_bias = jnp.zeros((1, 4 * modes1 * modes2), dtype=jnp.float32)

    params = {
        "modes1": modes1,
        "modes2": modes2,
        "weights1": w1.astype(jnp.complex64),
        "weights2": w2.astype(jnp.complex64),
        "fl_weights": fl_weights,
        "fl_bias": fl_bias,
    }

    x = jax.random.normal(keys[5], (B, in_channels, H, W), dtype=jnp.float32)
    emb = jax.random.normal(keys[6], (B, cond_channels), dtype=jnp.float32)

    out = spectral_conv2d_cond_forward(x, params, emb)
    out = jax.block_until_ready(out)

    ref = jax.block_until_ready(_reference_forward(x, params, emb))
    assert out.shape == (B, out_channels, H, W)
    assert jnp.allclose(out, ref, rtol=1e-4, atol=1e-4)

    # Also check the unconditional (emb=None) path.
    out_nc = jax.block_until_ready(spectral_conv2d_cond_forward(x, params, None))
    ref_nc = jax.block_until_ready(_reference_forward(x, params, None))
    assert jnp.allclose(out_nc, ref_nc, rtol=1e-4, atol=1e-4)

    print("KERNEL_OK")
</pallas_src>

<mosaic_0001>
module attributes {stable_mosaic.version = 11 : i64} {
  func.func @_batchmul_kernel(%arg0: i32, %arg1: i32, %arg2: memref<1x1x4x128xf32, #tpu.memory_space<vmem>>, %arg3: memref<1x1x4x128xf32, #tpu.memory_space<vmem>>, %arg4: memref<1x4x4x128xf32, #tpu.memory_space<vmem>>, %arg5: memref<1x4x4x128xf32, #tpu.memory_space<vmem>>, %arg6: memref<1x1x1x128xf32, #tpu.memory_space<vmem>>, %arg7: memref<1x1x1x128xf32, #tpu.memory_space<vmem>>, %arg8: memref<1x1x4x128xf32, #tpu.memory_space<vmem>>, %arg9: memref<1x1x4x128xf32, #tpu.memory_space<vmem>>) attributes {dimension_semantics = [#tpu.dimension_semantics<parallel>, #tpu.dimension_semantics<parallel>], iteration_bounds = array<i64: 2, 2>, scalar_prefetch = 0 : i64, scratch_operands = 0 : i64, tpu.core_type = #tpu.core_type<tc>, window_params = [{transform_indices = @transform_0, window_bounds = array<i64: 1, 1, 4, 128>}, {transform_indices = @transform_1, window_bounds = array<i64: 1, 1, 4, 128>}, {transform_indices = @transform_2, window_bounds = array<i64: 1, 4, 4, 128>}, {transform_indices = @transform_3, window_bounds = array<i64: 1, 4, 4, 128>}, {transform_indices = @transform_4, window_bounds = array<i64: 1, 1, 1, 128>}, {transform_indices = @transform_5, window_bounds = array<i64: 1, 1, 1, 128>}, {transform_indices = @transform_6, window_bounds = array<i64: 1, 1, 4, 128>}, {transform_indices = @transform_7, window_bounds = array<i64: 1, 1, 4, 128>}]} {
    %c0 = arith.constant 0 : index
    %c0_0 = arith.constant 0 : index
    %c0_1 = arith.constant 0 : index
    %c0_2 = arith.constant 0 : index
    %0 = vector.load %arg2[%c0, %c0_0, %c0_1, %c0_2] : memref<1x1x4x128xf32, #tpu.memory_space<vmem>>, vector<1x1x4x128xf32>
    %1 = vector.shape_cast %0 : vector<1x1x4x128xf32> to vector<4x128xf32>
    %c0_3 = arith.constant 0 : index
    %c0_4 = arith.constant 0 : index
    %c0_5 = arith.constant 0 : index
    %c0_6 = arith.constant 0 : index
    %2 = vector.load %arg3[%c0_3, %c0_4, %c0_5, %c0_6] : memref<1x1x4x128xf32, #tpu.memory_space<vmem>>, vector<1x1x4x128xf32>
    %3 = vector.shape_cast %2 : vector<1x1x4x128xf32> to vector<4x128xf32>
    %c0_7 = arith.constant 0 : index
    %c0_8 = arith.constant 0 : index
    %c0_9 = arith.constant 0 : index
    %c0_10 = arith.constant 0 : index
    %4 = vector.load %arg6[%c0_7, %c0_8, %c0_9, %c0_10] : memref<1x1x1x128xf32, #tpu.memory_space<vmem>>, vector<1x1x1x128xf32>
    %5 = vector.shape_cast %4 : vector<1x1x1x128xf32> to vector<1x128xf32>
    %c0_11 = arith.constant 0 : index
    %c0_12 = arith.constant 0 : index
    %c0_13 = arith.constant 0 : index
    %c0_14 = arith.constant 0 : index
    %6 = vector.load %arg7[%c0_11, %c0_12, %c0_13, %c0_14] : memref<1x1x1x128xf32, #tpu.memory_space<vmem>>, vector<1x1x1x128xf32>
    %7 = vector.shape_cast %6 : vector<1x1x1x128xf32> to vector<1x128xf32>
    %8 = vector.broadcast %5 : vector<1x128xf32> to vector<4x128xf32>
    %9 = arith.mulf %1, %8 : vector<4x128xf32>
    %10 = vector.broadcast %7 : vector<1x128xf32> to vector<4x128xf32>
    %11 = arith.mulf %3, %10 : vector<4x128xf32>
    %12 = arith.subf %9, %11 : vector<4x128xf32>
    %13 = vector.broadcast %7 : vector<1x128xf32> to vector<4x128xf32>
    %14 = arith.mulf %1, %13 : vector<4x128xf32>
    %15 = vector.broadcast %5 : vector<1x128xf32> to vector<4x128xf32>
    %16 = arith.mulf %3, %15 : vector<4x128xf32>
    %17 = arith.addf %14, %16 : vector<4x128xf32>
    %cst = arith.constant 0.000000e+00 : f32
    %18 = vector.broadcast %cst : f32 to vector<4x128xf32>
    %cst_15 = arith.constant 0.000000e+00 : f32
    %19 = vector.broadcast %cst_15 : f32 to vector<4x128xf32>
    %c0_16 = arith.constant 0 : index
    %c0_17 = arith.constant 0 : index
    %c0_18 = arith.constant 0 : index
    %c0_19 = arith.constant 0 : index
    %20 = vector.load %arg4[%c0_16, %c0_17, %c0_18, %c0_19] : memref<1x4x4x128xf32, #tpu.memory_space<vmem>>, vector<1x1x4x128xf32>
    %21 = vector.shape_cast %20 : vector<1x1x4x128xf32> to vector<4x128xf32>
    %c0_20 = arith.constant 0 : index
    %c0_21 = arith.constant 0 : index
    %c0_22 = arith.constant 0 : index
    %c0_23 = arith.constant 0 : index
    %22 = vector.load %arg5[%c0_20, %c0_21, %c0_22, %c0_23] : memref<1x4x4x128xf32, #tpu.memory_space<vmem>>, vector<1x1x4x128xf32>
    %23 = vector.shape_cast %22 : vector<1x1x4x128xf32> to vector<4x128xf32>
    %24 = vector.extract_strided_slice %12 {offsets = [0, 0], sizes = [1, 128], strides = [1, 1]} : vector<4x128xf32> to vector<1x128xf32>
    %25 = vector.extract_strided_slice %17 {offsets = [0, 0], sizes = [1, 128], strides = [1, 1]} : vector<4x128xf32> to vector<1x128xf32>
    %26 = vector.broadcast %24 : vector<1x128xf32> to vector<4x128xf32>
    %27 = arith.mulf %26, %21 : vector<4x128xf32>
    %28 = vector.broadcast %25 : vector<1x128xf32> to vector<4x128xf32>
    %29 = arith.mulf %28, %23 : vector<4x128xf32>
    %30 = arith.subf %27, %29 : vector<4x128xf32>
    %31 = arith.addf %18, %30 : vector<4x128xf32>
    %32 = vector.broadcast %24 : vector<1x128xf32> to vector<4x128xf32>
    %33 = arith.mulf %32, %23 : vector<4x128xf32>
    %34 = vector.broadcast %25 : vector<1x128xf32> to vector<4x128xf32>
    %35 = arith.mulf %34, %21 : vector<4x128xf32>
    %36 = arith.addf %33, %35 : vector<4x128xf32>
    %37 = arith.addf %19, %36 : vector<4x128xf32>
    %c0_24 = arith.constant 0 : index
    %c1 = arith.constant 1 : index
    %c0_25 = arith.constant 0 : index
    %c0_26 = arith.constant 0 : index
    %38 = vector.load %arg4[%c0_24, %c1, %c0_25, %c0_26] : memref<1x4x4x128xf32, #tpu.memory_space<vmem>>, vector<1x1x4x128xf32>
    %39 = vector.shape_cast %38 : vector<1x1x4x128xf32> to vector<4x128xf32>
    %c0_27 = arith.constant 0 : index
    %c1_28 = arith.constant 1 : index
    %c0_29 = arith.constant 0 : index
    %c0_30 = arith.constant 0 : index
    %40 = vector.load %arg5[%c0_27, %c1_28, %c0_29, %c0_30] : memref<1x4x4x128xf32, #tpu.memory_space<vmem>>, vector<1x1x4x128xf32>
    %41 = vector.shape_cast %40 : vector<1x1x4x128xf32> to vector<4x128xf32>
    %42 = vector.extract_strided_slice %12 {offsets = [1, 0], sizes = [1, 128], strides = [1, 1]} : vector<4x128xf32> to vector<1x128xf32>
    %43 = vector.extract_strided_slice %17 {offsets = [1, 0], sizes = [1, 128], strides = [1, 1]} : vector<4x128xf32> to vector<1x128xf32>
    %44 = vector.broadcast %42 : vector<1x128xf32> to vector<4x128xf32>
    %45 = arith.mulf %44, %39 : vector<4x128xf32>
    %46 = vector.broadcast %43 : vector<1x128xf32> to vector<4x128xf32>
    %47 = arith.mulf %46, %41 : vector<4x128xf32>
    %48 = arith.subf %45, %47 : vector<4x128xf32>
    %49 = arith.addf %31, %48 : vector<4x128xf32>
    %50 = vector.broadcast %42 : vector<1x128xf32> to vector<4x128xf32>
    %51 = arith.mulf %50, %41 : vector<4x128xf32>
    %52 = vector.broadcast %43 : vector<1x128xf32> to vector<4x128xf32>
    %53 = arith.mulf %52, %39 : vector<4x128xf32>
    %54 = arith.addf %51, %53 : vector<4x128xf32>
    %55 = arith.addf %37, %54 : vector<4x128xf32>
    %c0_31 = arith.constant 0 : index
    %c2 = arith.constant 2 : index
    %c0_32 = arith.constant 0 : index
    %c0_33 = arith.constant 0 : index
    %56 = vector.load %arg4[%c0_31, %c2, %c0_32, %c0_33] : memref<1x4x4x128xf32, #tpu.memory_space<vmem>>, vector<1x1x4x128xf32>
    %57 = vector.shape_cast %56 : vector<1x1x4x128xf32> to vector<4x128xf32>
    %c0_34 = arith.constant 0 : index
    %c2_35 = arith.constant 2 : index
    %c0_36 = arith.constant 0 : index
    %c0_37 = arith.constant 0 : index
    %58 = vector.load %arg5[%c0_34, %c2_35, %c0_36, %c0_37] : memref<1x4x4x128xf32, #tpu.memory_space<vmem>>, vector<1x1x4x128xf32>
    %59 = vector.shape_cast %58 : vector<1x1x4x128xf32> to vector<4x128xf32>
    %60 = vector.extract_strided_slice %12 {offsets = [2, 0], sizes = [1, 128], strides = [1, 1]} : vector<4x128xf32> to vector<1x128xf32>
    %61 = vector.extract_strided_slice %17 {offsets = [2, 0], sizes = [1, 128], strides = [1, 1]} : vector<4x128xf32> to vector<1x128xf32>
    %62 = vector.broadcast %60 : vector<1x128xf32> to vector<4x128xf32>
    %63 = arith.mulf %62, %57 : vector<4x128xf32>
    %64 = vector.broadcast %61 : vector<1x128xf32> to vector<4x128xf32>
    %65 = arith.mulf %64, %59 : vector<4x128xf32>
    %66 = arith.subf %63, %65 : vector<4x128xf32>
    %67 = arith.addf %49, %66 : vector<4x128xf32>
    %68 = vector.broadcast %60 : vector<1x128xf32> to vector<4x128xf32>
    %69 = arith.mulf %68, %59 : vector<4x128xf32>
    %70 = vector.broadcast %61 : vector<1x128xf32> to vector<4x128xf32>
    %71 = arith.mulf %70, %57 : vector<4x128xf32>
    %72 = arith.addf %69, %71 : vector<4x128xf32>
    %73 = arith.addf %55, %72 : vector<4x128xf32>
    %c0_38 = arith.constant 0 : index
    %c3 = arith.constant 3 : index
    %c0_39 = arith.constant 0 : index
    %c0_40 = arith.constant 0 : index
    %74 = vector.load %arg4[%c0_38, %c3, %c0_39, %c0_40] : memref<1x4x4x128xf32, #tpu.memory_space<vmem>>, vector<1x1x4x128xf32>
    %75 = vector.shape_cast %74 : vector<1x1x4x128xf32> to vector<4x128xf32>
    %c0_41 = arith.constant 0 : index
    %c3_42 = arith.constant 3 : index
    %c0_43 = arith.constant 0 : index
    %c0_44 = arith.constant 0 : index
    %76 = vector.load %arg5[%c0_41, %c3_42, %c0_43, %c0_44] : memref<1x4x4x128xf32, #tpu.memory_space<vmem>>, vector<1x1x4x128xf32>
    %77 = vector.shape_cast %76 : vector<1x1x4x128xf32> to vector<4x128xf32>
    %78 = vector.extract_strided_slice %12 {offsets = [3, 0], sizes = [1, 128], strides = [1, 1]} : vector<4x128xf32> to vector<1x128xf32>
    %79 = vector.extract_strided_slice %17 {offsets = [3, 0], sizes = [1, 128], strides = [1, 1]} : vector<4x128xf32> to vector<1x128xf32>
    %80 = vector.broadcast %78 : vector<1x128xf32> to vector<4x128xf32>
    %81 = arith.mulf %80, %75 : vector<4x128xf32>
    %82 = vector.broadcast %79 : vector<1x128xf32> to vector<4x128xf32>
    %83 = arith.mulf %82, %77 : vector<4x128xf32>
    %84 = arith.subf %81, %83 : vector<4x128xf32>
    %85 = arith.addf %67, %84 : vector<4x128xf32>
    %86 = vector.broadcast %78 : vector<1x128xf32> to vector<4x128xf32>
    %87 = arith.mulf %86, %77 : vector<4x128xf32>
    %88 = vector.broadcast %79 : vector<1x128xf32> to vector<4x128xf32>
    %89 = arith.mulf %88, %75 : vector<4x128xf32>
    %90 = arith.addf %87, %89 : vector<4x128xf32>
    %91 = arith.addf %73, %90 : vector<4x128xf32>
    %c0_45 = arith.constant 0 : index
    %c0_46 = arith.constant 0 : index
    %c0_47 = arith.constant 0 : index
    %c0_48 = arith.constant 0 : index
    %92 = vector.load %arg8[%c0_45, %c0_46, %c0_47, %c0_48] : memref<1x1x4x128xf32, #tpu.memory_space<vmem>>, vector<1x1x4x128xf32>
    %93 = vector.shape_cast %92 : vector<1x1x4x128xf32> to vector<4x128xf32>
    %94 = vector.shape_cast %85 : vector<4x128xf32> to vector<1x1x4x128xf32>
    tpu.vector_store %arg8[%c0_45, %c0_46, %c0_47, %c0_48], %94 {strides = array<i32>} : memref<1x1x4x128xf32, #tpu.memory_space<vmem>>, vector<1x1x4x128xf32>,
    %c0_49 = arith.constant 0 : index
    %c0_50 = arith.constant 0 : index
    %c0_51 = arith.constant 0 : index
    %c0_52 = arith.constant 0 : index
    %95 = vector.load %arg9[%c0_49, %c0_50, %c0_51, %c0_52] : memref<1x1x4x128xf32, #tpu.memory_space<vmem>>, vector<1x1x4x128xf32>
    %96 = vector.shape_cast %95 : vector<1x1x4x128xf32> to vector<4x128xf32>
    %97 = vector.shape_cast %91 : vector<4x128xf32> to vector<1x1x4x128xf32>
    tpu.vector_store %arg9[%c0_49, %c0_50, %c0_51, %c0_52], %97 {strides = array<i32>} : memref<1x1x4x128xf32, #tpu.memory_space<vmem>>, vector<1x1x4x128xf32>,
    return
  }
  func.func @transform_0(%arg0: i32, %arg1: i32) -> (i32, i32, i32, i32) {
    %c0_i32 = arith.constant 0 : i32
    %c0_i32_0 = arith.constant 0 : i32
    %c0_i32_1 = arith.constant 0 : i32
    return %arg0, %arg1, %c0_i32, %c0_i32_0 : i32, i32, i32, i32
  }
  func.func @transform_1(%arg0: i32, %arg1: i32) -> (i32, i32, i32, i32) {
    %c0_i32 = arith.constant 0 : i32
    %c0_i32_0 = arith.constant 0 : i32
    %c0_i32_1 = arith.constant 0 : i32
    return %arg0, %arg1, %c0_i32, %c0_i32_0 : i32, i32, i32, i32
  }
  func.func @transform_2(%arg0: i32, %arg1: i32) -> (i32, i32, i32, i32) {
    %c0_i32 = arith.constant 0 : i32
    %c0_i32_0 = arith.constant 0 : i32
    %c0_i32_1 = arith.constant 0 : i32
    %c0_i32_2 = arith.constant 0 : i32
    return %arg0, %c0_i32, %c0_i32_0, %c0_i32_1 : i32, i32, i32, i32
  }
  func.func @transform_3(%arg0: i32, %arg1: i32) -> (i32, i32, i32, i32) {
    %c0_i32 = arith.constant 0 : i32
    %c0_i32_0 = arith.constant 0 : i32
    %c0_i32_1 = arith.constant 0 : i32
    %c0_i32_2 = arith.constant 0 : i32
    return %arg0, %c0_i32, %c0_i32_0, %c0_i32_1 : i32, i32, i32, i32
  }
  func.func @transform_4(%arg0: i32, %arg1: i32) -> (i32, i32, i32, i32) {
    %c0_i32 = arith.constant 0 : i32
    %c0_i32_0 = arith.constant 0 : i32
    %c0_i32_1 = arith.constant 0 : i32
    return %arg0, %arg1, %c0_i32, %c0_i32_0 : i32, i32, i32, i32
  }
  func.func @transform_5(%arg0: i32, %arg1: i32) -> (i32, i32, i32, i32) {
    %c0_i32 = arith.constant 0 : i32
    %c0_i32_0 = arith.constant 0 : i32
    %c0_i32_1 = arith.constant 0 : i32
    return %arg0, %arg1, %c0_i32, %c0_i32_0 : i32, i32, i32, i32
  }
  func.func @transform_6(%arg0: i32, %arg1: i32) -> (i32, i32, i32, i32) {
    %c0_i32 = arith.constant 0 : i32
    %c0_i32_0 = arith.constant 0 : i32
    %c0_i32_1 = arith.constant 0 : i32
    return %arg0, %arg1, %c0_i32, %c0_i32_0 : i32, i32, i32, i32
  }
  func.func @transform_7(%arg0: i32, %arg1: i32) -> (i32, i32, i32, i32) {
    %c0_i32 = arith.constant 0 : i32
    %c0_i32_0 = arith.constant 0 : i32
    %c0_i32_1 = arith.constant 0 : i32
    return %arg0, %arg1, %c0_i32, %c0_i32_0 : i32, i32, i32, i32
  }
}

</mosaic_0001>

<bundles_post_ra>
// kernel: tpu_custom_call.1
= control target key start
LH: loop header
LB: loop body
LE: loop exit
PB: predicated region body
PF: predicated region fallthrough
CT: control target
= control target key end

     0   :  { %s1835_s0 = inlined_call_operand.hbm [shape: f32[2,2,4,128], index: 0, kind: input, shape index: {}]   ;;  %s1836_s1 = inlined_call_operand.hbm [shape: f32[2,2,4,128], index: 1, kind: input, shape index: {}]   ;;  %s1837_s2 = inlined_call_operand.hbm [shape: f32[2,4,4,128], index: 2, kind: input, shape index: {}]   ;;  %s1838_s3 = inlined_call_operand.hbm [shape: f32[2,4,4,128], index: 3, kind: input, shape index: {}]   ;;  %s1839_s4 = inlined_call_operand.vmem [shape: f32[2,2,1,128], index: 4, kind: input, shape index: {}]   ;;  %s1840_s5 = inlined_call_operand.vmem [shape: f32[2,2,1,128], index: 5, kind: input, shape index: {}]   ;;  %s1841_s6 = inlined_call_operand.hbm [shape: f32[2,2,4,128], index: 6, kind: output, shape index: {0}]   ;;  %s1842_s7 = inlined_call_operand.hbm [shape: f32[2,2,4,128], index: 7, kind: output, shape index: {1}]  }
   0x1   :  { %1860 = sst [smem:[#allocation28_spill]] %s1835_s0 }
   0x2   :  { %1861 = sst [smem:[#allocation29_spill]] %s1836_s1 }
   0x3   :  { %1862 = sst [smem:[#allocation30_spill]] %s1841_s6 }
   0x4   :  { %1863 = sst [smem:[#allocation31_spill]] %s1842_s7 }
   0x5   :  { %13 = vsyncpa [#allocation3], 0 }
   0x6   :  { %15 = vsyncpa [#allocation3 + $0x1], 0 }
   0x7   :  { %16 = vsyncpa [#allocation6], 0 }
   0x8   :  { %18 = vsyncpa [#allocation6 + $0x1], 0 }
   0x9   :  { %19 = vsyncpa [#allocation9], 0 }
   0xa   :  { %21 = vsyncpa [#allocation9 + $0x1], 0 }
   0xb   :  { %22 = vsyncpa [#allocation4], 0 }
   0xc   :  { %24 = vsyncpa [#allocation4 + $0x1], 0 }
   0xd   :  { %25 = vsyncpa [#allocation12], 0 }
   0xe   :  { %27 = vsyncpa [#allocation12 + $0x1], 0  ;;  %s1357_s24 = smov 0   ;;  %s1359_s25 = smov 0  }
   0xf   :  { %s1361_s26 = smov 0   ;;  %s1363_s27 = smov 0  }
  0x10   :  { %s1365_s28 = smov 0   ;;  %s1367_s29 = smov 0  }
  0x11   :  { %s1369_s30 = smov 0   ;;  %s1371_s8 = smov 0  }
  0x12   :  { %s1373_s9 = smov 0   ;;  %s1375_s10 = smov 0  }
  0x13   :  { %s1377_s11 = smov 0  }
  0x14 LB: > { %1864 = sst [smem:[#allocation19_spill]] %s1279_s27  ;;  %s1413_s12 = sadd.s32 4294967295, %s1307_s11   ;;  %s1307_s11 = sphi %s1377_s11, %s33_s11   ;;  %s1303_s10 = sphi %s1375_s10, %s1912_s10   ;;  %s1299_s9 = sphi %s1373_s9, %s1902_s9   ;;  %s1295_s8 = sphi %s1371_s8, %s1911_s8   ;;  %s1291_s30 = sphi %s1369_s30, %s1910_s30   ;;  %s1287_s29 = sphi %s1367_s29, %s1909_s29   ;;  %s1283_s28 = sphi %s1365_s28, %s1908_s28   ;;  %s1279_s27 = sphi %s1363_s27, %s1907_s27   ;;  %s1275_s26 = sphi %s1361_s26, %s1906_s26   ;;  %s1271_s25 = sphi %s1359_s25, %s1905_s25   ;;  %s1267_s24 = sphi %s1357_s24, %s1904_s24  }
  0x15   : > { %1865 = sst [smem:[#allocation20_spill]] %s1299_s9  ;;  %s855_s13 = sadd.s32 4294967294, %s1307_s11  }
  0x16   : > { %1866 = sst [smem:[#allocation21_spill]] %s1307_s11  ;;  %s42_s14 = sadd.s32 1, %s1299_s9 }
  0x17   : > { %s45_s15 = sadd.s32 1, %s1303_s10  ;;  %p43_p0 = scmp.ge.s32.totalorder %s42_s14, 2 }
  0x18   : > { %s54_s16 = sadd.s32 1, %s1287_s29  ;;  %p61_p1 = scmp.ne.s32.totalorder %s1287_s29, %s1283_s28 }
  0x19   : > { %p62_p2 = scmp.eq.s32.totalorder %s1307_s11, 0  ;;  %s1914_s14 = smov (%p43_p0, %s42_s14), 0 }
  0x1a   : > { %1867 = sst [smem:[#allocation22_spill]] %s1914_s14  ;;  %s1916_s15 = smov (!%p43_p0, %s45_s15), %s1303_s10 }
  0x1b   : > { %s50_s17 = ssub.s32 %s1299_s9, %s1914_s14  ;;  %p1432_p3 = por %p62_p2, %p61_p1 }
  0x1c   : > { %p47_p4 = scmp.ge.s32.totalorder %s1916_s15, 2  ;;  %p1846_p5 = scmp.ne.s32.totalorder %s1283_s28, %s1279_s27 }
  0x1d   : > { %p68_p6 = scmp.eq.s32.totalorder %s1413_s12, 0  ;;  %s108_s19 = sadd.s32 1, %s1275_s26 }
  0x1e   : > { %s1918_s15 = smov (%p47_p4, %s1916_s15), 0  ;;  %p115_p8 = scmp.ne.s32.totalorder %s1275_s26, %s1271_s25 }
  0x1f   : > { %1869 = sst [smem:[#allocation23_spill]] %s1918_s15  ;;  %p1447_p7 = por %p68_p6, %p1846_p5 }
  0x20   : > { %s49_s21 = ssub.s32 %s1303_s10, %s1918_s15  ;;  %p121_p9 = scmp.ne.s32.totalorder %s1271_s25, %s1267_s24 }
  0x21   : > { %s1870_s20 = scalar_select %p1447_p7, 1, 0 }
  0x22   : > { %s51_s22 = sor.u32 %s50_s17, %s49_s21  ;;  %p106_p10 = scmp.eq.s32.totalorder %s49_s21, 0 }
  0x23   : > { %p52_p11 = scmp.eq.s32.totalorder %s51_s22, 0  ;;  %p1459_p12 = por %p115_p8, %p62_p2 }
  0x24   : > { %s1464_s14 = scalar_select %p106_p10, %s1275_s26, %s108_s19  }
  0x25   : > { %s1467_s7 = scalar_select %p52_p11, %s1287_s29, %s54_s16  }
  0x26   : > { %1872 = sst [smem:[#allocation24_spill]] %s1464_s14  ;;  %p1471_p13 = por %p121_p9, %p68_p6 }
  0x27   : > { %1873 = sst [smem:[#allocation25_spill]] %s1467_s7  ;;  %p229_p0 = scmp.eq.s32.totalorder %s1413_s12, 3 }
  0x28   : > { %s1874_s15 = scalar_select %p1471_p13, 1, 0 }
  0x29   : > { %p235_p4 = scmp.eq.s32.totalorder %s855_s13, 3  ;;  %p1479_p5 = por %p229_p0, %p61_p1 }
  0x2a   : > { %p929_p2 = scmp.lt.s32.totalorder %s1307_s11, 4  ;;  %p1877_p8 = scmp.ne.s32.totalorder %s1283_s28, %s1279_s27 }
  0x2b   : > { %s1875_s24 = scalar_select %p1479_p5, 1, 0 }
  0x2c   : > { %p1487_p10 = por %p235_p4, %p1877_p8  ;;  %s1849_s16 = sand.u32 1, %s1287_s29  }
  0x2d   : > { %1876 = sst [smem:[#allocation26_spill]] %s1875_s24  ;;  %s1494_s19 = sshll.u32 %s1849_s16, 2 }
  0x2e   : > { %s1878_s17 = scalar_select %p1487_p10, 1, 0 }
  0x2f   : > { %s859_s21 = sshll.u32 %s1303_s10, 1  ;;  %p1502_p1 = pnand %p929_p2, %p1432_p3 }
  0x30   : > { %1879 = sst [smem:[#allocation27_spill]] %s1878_s17  ;;  %s1498_s22 = sadd.s32 %s1299_s9, %s859_s21 }
  0x31   : > { %s1854_s7 = sshll.u32 %s1498_s22, 6  ;;  %s303_s14 = sand.u32 1, %s1307_s11  }
  0x32   : > { %s1881_s1 = sld [smem:[#allocation29_spill]]  ;;  %s307_s18 = scalar_lea.vmem [#allocation5], %s1494_s19 }
  0x33   : > { %s316_s21 = sshll.u32 %s307_s18, 4  ;;  %p1518_p3 = pnand %p929_p2, %p1459_p12  ;;  %s1522_s21 = int_to_ptr.vmem [resolvable:$true] %s316_s21 }
  0x34   : > { %s1525_s6 = scalar_lea.sflag [#allocation6], %s303_s14  ;;  %p1023_p11 = pneg %p1502_p1 }
  0x38   : > { %s1513_s16 = scalar_lea.hbm %s1881_s1, %s1854_s7  ;;  %s1026_s23 = scalar_lea.hbm %s1881_s1, 256 }
  0x39   : > { %s1021_s24 = scalar_lea.hbm %s1513_s16, 64  ;;  %p1027_p12 = scmp.lt.u32.totalorder %s1513_s16, %s1881_s1 }
  0x3a   : > { %p1022_p9 = scmp.ne.s32.totalorder %s1513_s16, %s1021_s24  ;;  %p1028_p2 = scmp.lt.u32.totalorder %s1026_s23, %s1021_s24 }
  0x3b   : > { %p1030_p6 = scmp.lt.u32.totalorder %s1021_s24, %s1513_s16 }
  0x3c   : > { %p1024_p0 = pnand %p1023_p11, %p1022_p9  ;;  %p1029_p8 = por %p1028_p2, %p1027_p12 }
  0x3e   : > { %p1025_p4 = pneg %p1024_p0  ;;  %p1031_p10 = por %p1030_p6, %p1029_p8 }
  0x40   : > { %p1032_p5 = pnand %p1031_p10, %p1025_p4 }
  0x42   : > { %1035 = shalt.err (!%p1032_p5)
}
  0x43   : > { %s1036_s14 = scalar_lea.vmem %s1522_s21, 64  ;;  %s1309_s27 = smov [#allocation5]  }
  0x44   : > { %p1037_p9 = scmp.ne.s32.totalorder %s1522_s21, %s1036_s14  ;;  %s1041_s17 = sshll.u32 %s1309_s27, 4  ;;  %s1042_s17 = int_to_ptr.vmem [resolvable:$false] %s1041_s17 }
  0x45   : > { %s1043_s7 = scalar_lea.vmem %s1042_s17, 128  ;;  %p1044_p7 = scmp.lt.s32.totalorder %s1522_s21, %s1042_s17 }
  0x46   : > { %p1039_p0 = pnand %p1037_p9, %p1023_p11  ;;  %p1045_p12 = scmp.lt.s32.totalorder %s1043_s7, %s1036_s14 }
  0x48   : > { %p1040_p13 = pneg %p1039_p0  ;;  %p1046_p2 = por %p1045_p12, %p1044_p7 }
  0x4a   : > { %p1047_p6 = pnand %p1046_p2, %p1040_p13 }
  0x4c   : > { %1050 = shalt.err (!%p1047_p6)
}
  0x4d   : > { %915 = dma.hbm_to_vmem [thread:$0]  (!%p1502_p1), %s1513_s16, 64, %s1522_s21, %s1525_s6  }
  0x4e   : > { %p383_p5 = scmp.lt.s32.totalorder %s1307_s11, 5  ;;  %p1883_p10 = scmp.ge.s32.totalorder %s1307_s11, 1 }
  0x4f   : > { %s1885_s23 = sshll.u32 %s1498_s22, 6  ;;  %s1886_s0 = sld [smem:[#allocation28_spill]] }
  0x50   : > { %p1556_p4 = pnand %p1883_p10, %p383_p5  ;;  %s287_s17 = scalar_lea.vmem [#allocation2], %s1494_s19 }
  0x51   : > { %s296_s7 = sshll.u32 %s287_s17, 4  ;;  %s325_s1 = sand.u32 1, %s1275_s26   ;;  %s1569_s7 = int_to_ptr.vmem [resolvable:$true] %s296_s7 }
  0x52   : > { %s1884_s24 = scalar_select %p1556_p4, 1, 0 }
  0x53   : > { %s1573_s16 = sshll.u32 %s325_s1, 4  ;;  %s1887_s21 = sand.u32 1, %s1287_s29  }
  0x54   : > { %s284_s11 = scalar_lea.sflag [#allocation3], %s1887_s21 }
  0x55   : > { %s1565_s27 = scalar_lea.hbm %s1886_s0, %s1885_s23  ;;  %s1056_s14 = scalar_lea.hbm %s1886_s0, 256 }
  0x56   : > { %s1051_s22 = scalar_lea.hbm %s1565_s27, 64  ;;  %p1057_p9 = scmp.lt.u32.totalorder %s1565_s27, %s1886_s0 }
  0x57   : > { %p1052_p7 = scmp.ne.s32.totalorder %s1565_s27, %s1051_s22  ;;  %p1058_p0 = scmp.lt.u32.totalorder %s1056_s14, %s1051_s22 }
  0x58   : > { %p1060_p2 = scmp.lt.u32.totalorder %s1051_s22, %s1565_s27 }
  0x59   : > { %p1054_p13 = pnand %p1052_p7, %p1023_p11  ;;  %p1059_p12 = por %p1058_p0, %p1057_p9 }
  0x5b   : > { %p1055_p8 = pneg %p1054_p13  ;;  %p1061_p6 = por %p1060_p2, %p1059_p12 }
  0x5d   : > { %p1062_p5 = pnand %p1061_p6, %p1055_p8 }
  0x5f   : > { %1065 = shalt.err (!%p1062_p5)
}
  0x60   : > { %s1066_s21 = scalar_lea.vmem %s1569_s7, 64  ;;  %s1310_s23 = smov [#allocation2]  }
  0x61   : > { %p1067_p10 = scmp.ne.s32.totalorder %s1569_s7, %s1066_s21  ;;  %s1071_s18 = sshll.u32 %s1310_s23, 4  ;;  %s1072_s18 = int_to_ptr.vmem [resolvable:$false] %s1071_s18 }
  0x62   : > { %s1073_s19 = scalar_lea.vmem %s1072_s18, 128  ;;  %p1074_p4 = scmp.lt.s32.totalorder %s1569_s7, %s1072_s18 }
  0x63   : > { %p1069_p7 = pnand %p1067_p10, %p1023_p11  ;;  %p1075_p9 = scmp.lt.s32.totalorder %s1073_s19, %s1066_s21 }
  0x65   : > { %p1070_p13 = pneg %p1069_p7  ;;  %p1076_p0 = por %p1075_p9, %p1074_p4 }
  0x67   : > { %p1077_p12 = pnand %p1076_p0, %p1070_p13 }
  0x69   : > { %1080 = shalt.err (!%p1077_p12)
}
  0x6a   : > { %912 = dma.hbm_to_vmem [thread:$0]  (!%p1502_p1), %s1565_s27, 64, %s1569_s7, %s284_s11  }
  0x6b   : > { %s895_s22 = sshll.u32 %s1303_s10, 8  ;;  %s327_s13 = scalar_lea.vmem [#allocation7], %s1573_s16 }
  0x6c   : > { %s1606_s23 = scalar_lea.hbm %s1837_s2, %s895_s22  ;;  %s334_s21 = sshll.u32 %s327_s13, 4  ;;  %s1609_s21 = int_to_ptr.vmem [resolvable:$true] %s334_s21 }
  0x6d   : > { %s1081_s18 = scalar_lea.hbm %s1606_s23, 256  ;;  %p1083_p4 = pneg %p1518_p3 }
  0x6e   : > { %p1082_p11 = scmp.ne.s32.totalorder %s1606_s23, %s1081_s18  ;;  %s1086_s7 = scalar_lea.hbm %s1837_s2, 512 }
  0x6f   : > { %p1087_p2 = scmp.lt.u32.totalorder %s1606_s23, %s1837_s2  ;;  %p1088_p6 = scmp.lt.u32.totalorder %s1086_s7, %s1081_s18 }
  0x70   : > { %p1084_p1 = pnand %p1083_p4, %p1082_p11  ;;  %p1090_p10 = scmp.lt.u32.totalorder %s1081_s18, %s1606_s23 }
  0x71   : > { %p1089_p5 = por %p1088_p6, %p1087_p2 }
  0x72   : > { %p1085_p8 = pneg %p1084_p1 }
  0x73   : > { %p1091_p7 = por %p1090_p10, %p1089_p5 }
  0x75   : > { %p1092_p13 = pnand %p1091_p7, %p1085_p8 }
  0x77   : > { %1095 = shalt.err (!%p1092_p13)
}
  0x78   : > { %s1096_s17 = scalar_lea.vmem %s1609_s21, 256  ;;  %s1311_s13 = smov [#allocation7]  }
  0x79   : > { %p1097_p9 = scmp.ne.s32.totalorder %s1609_s21, %s1096_s17  ;;  %s1101_s11 = sshll.u32 %s1311_s13, 4  ;;  %s1102_s11 = int_to_ptr.vmem [resolvable:$false] %s1101_s11 }
  0x7a   : > { %s1103_s27 = scalar_lea.vmem %s1102_s11, 512  ;;  %p1104_p11 = scmp.lt.s32.totalorder %s1609_s21, %s1102_s11 }
  0x7b   : > { %p1099_p0 = pnand %p1097_p9, %p1083_p4  ;;  %p1105_p1 = scmp.lt.s32.totalorder %s1103_s27, %s1096_s17 }
  0x7d   : > { %p1100_p12 = pneg %p1099_p0  ;;  %p1106_p2 = por %p1105_p1, %p1104_p11 }
  0x7f   : > { %p1107_p6 = pnand %p1106_p2, %p1100_p12 }
  0x81   : > { %1110 = shalt.err (!%p1107_p6)
}
  0x82   : > { %s1312_s18 = smov 64   ;;  %s1313_s7 = smov 4  }
  0x83   : > { %918 = dma.hbm_to_vmem [thread:$0]  (!%p1518_p3), %s1606_s23, 256, %s1609_s21, %s1525_s6, %s1312_s18, %s1312_s18, %s1313_s7  }
  0x84   : > { %s1645_s17 = scalar_lea.hbm %s1838_s3, %s895_s22  ;;  %s348_s13 = scalar_lea.vmem [#allocation8], %s1573_s16 }
  0x85   : > { %s355_s11 = sshll.u32 %s348_s13, 4  ;;  %s1652_s27 = scalar_lea.sflag [#allocation9], %s325_s1  ;;  %s1648_s11 = int_to_ptr.vmem [resolvable:$true] %s355_s11 }
  0x86   : > { %s1111_s0 = scalar_lea.hbm %s1645_s17, 256  ;;  %s1116_s23 = scalar_lea.hbm %s1838_s3, 512 }
  0x87   : > { %p1112_p8 = scmp.ne.s32.totalorder %s1645_s17, %s1111_s0  ;;  %p1117_p7 = scmp.lt.u32.totalorder %s1645_s17, %s1838_s3 }
  0x88   : > { %p1118_p13 = scmp.lt.u32.totalorder %s1116_s23, %s1111_s0  ;;  %p1120_p0 = scmp.lt.u32.totalorder %s1111_s0, %s1645_s17 }
  0x89   : > { %p1114_p5 = pnand %p1112_p8, %p1083_p4 }
  0x8a   : > { %p1119_p9 = por %p1118_p13, %p1117_p7 }
  0x8b   : > { %p1115_p10 = pneg %p1114_p5 }
  0x8c   : > { %p1121_p12 = por %p1120_p0, %p1119_p9 }
  0x8e   : > { %p1122_p11 = pnand %p1121_p12, %p1115_p10 }
  0x90   : > { %1125 = shalt.err (!%p1122_p11)
}
  0x91   : > { %s1126_s1 = scalar_lea.vmem %s1648_s11, 256  ;;  %s1314_s16 = smov [#allocation8]  }
  0x92   : > { %p1127_p1 = scmp.ne.s32.totalorder %s1648_s11, %s1126_s1  ;;  %s1131_s14 = sshll.u32 %s1314_s16, 4  ;;  %s1132_s14 = int_to_ptr.vmem [resolvable:$false] %s1131_s14 }
  0x93   : > { %s1133_s13 = scalar_lea.vmem %s1132_s14, 512  ;;  %p1134_p8 = scmp.lt.s32.totalorder %s1648_s11, %s1132_s14 }
  0x94   : > { %p1129_p2 = pnand %p1127_p1, %p1083_p4  ;;  %p1135_p5 = scmp.lt.s32.totalorder %s1133_s13, %s1126_s1 }
  0x96   : > { %p1130_p6 = pneg %p1129_p2  ;;  %p1136_p7 = por %p1135_p5, %p1134_p8 }
  0x98   : > { %p1137_p13 = pnand %p1136_p7, %p1130_p6 }
  0x9a   : > { %1140 = shalt.err (!%p1137_p13)
}
  0x9b   : > { %921 = dma.hbm_to_vmem [thread:$0]  (!%p1518_p3), %s1645_s17, 256, %s1648_s11, %s1652_s27, %s1312_s18, %s1312_s18, %s1313_s7  }
  0x9c   : > { %p1888_p4 = scmp.ne.s32.totalorder %s1884_s24, 0 }
  0x9d   : > { %s1684_s0 = sand.u32 (!%p1888_p4), 1, %s1283_s28   ;;  %p1889_p10 = scmp.ne.s32.totalorder (!%p1888_p4), %s1870_s20, 0 }
  0x9e   : > { %387 = sbr.rel (%p1888_p4) target bundleno = 238 (0xee), region = 44  ;;  %s1687_s6 = sshll.u32 (!%p1888_p4), %s1684_s0, 2 }
  0x9f   : > { %s390_s9 = scalar_lea.sflag (!%p1888_p4), [#allocation3], %s1684_s0  ;;  %s393_s22 = scalar_lea.vmem (!%p1888_p4), [#allocation2], %s1687_s6 }
  0xa5   : > { %1242 = dma.done.wait (%p1889_p10), %s390_s9, 64  }
  0xa6   : > { %1244 = vsyncadd (%p1889_p10), %s390_s9, 4294967232  ;;  %s398_s24 = sand.u32 1, %s1413_s12   ;;  %s402_s7 = scalar_lea.vmem [#allocation5], %s1687_s6 }
  0xa7   : > { %s399_s18 = scalar_lea.sflag [#allocation6], %s398_s24 }
  0xa8   : > { %1246 = dma.done.wait (%p1889_p10), %s399_s18, 64  }
  0xa9   : > { %1248 = vsyncadd (%p1889_p10), %s399_s18, 4294967232  ;;  %s409_s17 = sand.u32 1, %s1271_s25   ;;  %p1890_p3 = scmp.ne.s32.totalorder %s1874_s15, 0 }
  0xaa   : > { %s873_s11 = sshll.u32 %s409_s17, 4 }
  0xab   : > { %s1702_s27 = scalar_lea.vmem [#allocation7], %s873_s11 }
  0xac   : > { %1250 = dma.done.wait (%p1890_p3), %s399_s18, 256  }
  0xad   : > { %1252 = vsyncadd (%p1890_p3), %s399_s18, 4294967040  ;;  %s417_s12 = scalar_lea.sflag [#allocation9], %s409_s17  ;;  %s1708_s23 = scalar_lea.vmem [#allocation8], %s873_s11 }
  0xae   : > { %1254 = dma.done.wait (%p1890_p3), %s417_s12, 256  }
  0xaf   : > { %1256 = vsyncadd (%p1890_p3), %s417_s12, 4294967040  ;;  %p485_p9 = scmp.lt.s32.totalorder %s1295_s8, 1  ;;  %p487_p0 = scmp.lt.s32.totalorder %s1291_s30, 1  ;;  %v523_v0 = vlaneseq  ;;  %v499_v2 = vld [vmem:[%s393_s22] sm:$0xf] }
  0xb0   : > { %v500_v3 = vld [vmem:[%s402_s7] sm:$0xf]  ;;  %v521_v16 = vld [vmem:[%s1702_s27] sm:$0xf]  ;;  %v881_v18 = vld [vmem:[%s1702_s27 + $0x4] sm:$0xf] }
  0xb1   : > { %s486_s20 = scalar_select %p485_p9, %s1295_s8, 1  ;;  %v524_v1 = vshrl.u32 %v523_v0, 7  ;;  %v522_v17 = vld [vmem:[%s1708_s23] sm:$0xf]  ;;  %v882_v19 = vld [vmem:[%s1708_s23 + $0x4] sm:$0xf] }
  0xb2   : > { %s488_s21 = scalar_select %p487_p0, %s1291_s30, 1  ;;  %v883_v20 = vld [vmem:[%s1702_s27 + $0x8] sm:$0xf]  ;;  %v885_v26 = vld [vmem:[%s1702_s27 + $0xc] sm:$0xf] }
  0xb3   : > { %s877_s19 = sshll.u32 %s486_s20, 1  ;;  %v525_v10 = vsub.s32 0, %v524_v1  ;;  %v545_v11 = vsub.s32 1, %v524_v1  ;;  %v565_v12 = vsub.s32 2, %v524_v1  ;;  %v585_v13 = vsub.s32 3, %v524_v1  ;;  %s889_s22 = sshll.u32 %s1295_s8, 1 }
  0xb4   : > { %s490_s1 = sadd.s32 %s877_s19, %s488_s21  ;;  %v884_v25 = vld [vmem:[%s1708_s23 + $0x8] sm:$0xf]  ;;  %v886_v27 = vld [vmem:[%s1708_s23 + $0xc] sm:$0xf]  ;;  %s618_s18 = sadd.s32 %s1291_s30, %s889_s22 }
  0xb5   : > { %s491_s13 = scalar_lea.vmem %s1839_s4, %s490_s1  ;;  %s498_s15 = scalar_lea.vmem %s1840_s5, %s490_s1 }
  0xb6   : > { %v879_v4 = vld [vmem:[%s491_s13] ss:$0 sm:$0xff]  ;;  %s477_s8 = scalar_lea.vmem [#allocation10], %s1687_s6  ;;  %s890_s17 = sshll.u32 %s618_s18, 6 }
  0xb7   : > { %v880_v5 = vld [vmem:[%s498_s15] ss:$0 sm:$0xff]  ;;  %v509_v6 = vmul.f32 %v879_v4, %v499_v2  ;;  %v519_v7 = vmul.f32 %v879_v4, %v500_v3  ;;  %s622_s7 = sshll.u32 %s477_s8, 4  ;;  %s1891_s30 = sld [smem:[#allocation26_spill]]  ;;  %s1738_s7 = int_to_ptr.vmem [resolvable:$true] %s622_s7 }
  0xb8   : > { %v516_v8 = vmul.f32 %v880_v5, %v500_v3  ;;  %v518_v9 = vmul.f32 %v880_v5, %v499_v2  ;;  %s484_s11 = scalar_lea.vmem [#allocation11], %s1687_s6  ;;  %s1892_s20 = sld [smem:[#allocation30_spill]] }
  0xb9   : > { %s637_s27 = sshll.u32 %s484_s11, 4  ;;  %s1893_s16 = sld [smem:[#allocation31_spill]]  ;;  %s1745_s27 = int_to_ptr.vmem [resolvable:$true] %s637_s27 }
  0xba   : > { %v517_v14 = vsub.f32 %v509_v6, %v516_v8  ;;  %v520_v15 = vadd.f32 %v519_v7, %v518_v9  ;;  %s602_s13 = scalar_lea.sflag [#allocation4], %s1684_s0  ;;  %s1141_s9 = scalar_lea.vmem %s1738_s7, 64 }
  0xbb   : > { %p1142_p12 = scmp.ne.s32.totalorder %s1738_s7, %s1141_s9  ;;  %s1315_s24 = smov [#allocation10]  }
  0xbc   : > { %v526_v21 = vrot.slane %v517_v14, %v525_v10  ;;  %v531_v22 = vrot.slane %v520_v15, %v525_v10  ;;  %v546_v23 = vrot.slane %v517_v14, %v545_v11  ;;  %v551_v24 = vrot.slane %v520_v15, %v545_v11  ;;  %s1145_s15 = sshll.u32 %s1315_s24, 4  ;;  %s1146_s15 = int_to_ptr.vmem [resolvable:$false] %s1145_s15 }
  0xbd   : > { %v566_v28 = vrot.slane %v517_v14, %v565_v12  ;;  %v571_v29 = vrot.slane %v520_v15, %v565_v12  ;;  %v586_v30 = vrot.slane %v517_v14, %v585_v13  ;;  %v591_v31 = vrot.slane %v520_v15, %v585_v13  ;;  %p1894_p11 = scmp.ne.s32.totalorder %s1891_s30, 0  ;;  %s1147_s22 = scalar_lea.vmem %s1146_s15, 128 }
  0xbe   : > { %v527_v32 = vmul.f32 %v526_v21, %v521_v16  ;;  %v532_v33 = vmul.f32 %v531_v22, %v522_v17  ;;  %v547_v34 = vmul.f32 %v881_v18, %v546_v23  ;;  %v552_v35 = vmul.f32 %v882_v19, %v551_v24  ;;  %s1743_s21 = scalar_lea.hbm %s1892_s20, %s890_s17  ;;  %p1148_p6 = scmp.lt.s32.totalorder %s1738_s7, %s1146_s15 }
  0xbf   : > { %v567_v36 = vmul.f32 %v883_v20, %v566_v28  ;;  %v572_v37 = vmul.f32 %v884_v25, %v571_v29  ;;  %v587_v38 = vmul.f32 %v885_v26, %v586_v30  ;;  %v592_v39 = vmul.f32 %v886_v27, %v591_v31  ;;  %s1750_s14 = scalar_lea.hbm %s1893_s16, %s890_s17  ;;  %p1143_p1 = pnand %p1142_p12, %p1894_p11 }
  0xc0   : > { %v533_v40 = vsub.f32 %v527_v32, %v532_v33  ;;  %v553_v41 = vsub.f32 %v547_v34, %v552_v35  ;;  %v535_v42 = vmul.f32 %v526_v21, %v522_v17  ;;  %v536_v43 = vmul.f32 %v531_v22, %v521_v16  ;;  %p1149_p8 = scmp.lt.s32.totalorder %s1147_s22, %s1141_s9 }
  0xc1   : > { %v573_v44 = vsub.f32 %v567_v36, %v572_v37  ;;  %v593_v45 = vsub.f32 %v587_v38, %v592_v39  ;;  %v555_v46 = vmul.f32 %v882_v19, %v546_v23  ;;  %v556_v47 = vmul.f32 %v881_v18, %v551_v24  ;;  %p1144_p2 = pneg %p1143_p1 }
  0xc2   : > { %v554_v48 = vadd.f32 %v553_v41, %v533_v40  ;;  %v537_v49 = vadd.f32 %v536_v43, %v535_v42  ;;  %v575_v50 = vmul.f32 %v884_v25, %v566_v28  ;;  %v576_v51 = vmul.f32 %v883_v20, %v571_v29  ;;  %p1150_p5 = por %p1149_p8, %p1148_p6 }
  0xc3   : > { %v557_v52 = vadd.f32 %v556_v47, %v555_v46  ;;  %v595_v53 = vmul.f32 %v886_v27, %v586_v30  ;;  %v596_v54 = vmul.f32 %v885_v26, %v591_v31 }
  0xc4   : > { %v574_v55 = vadd.f32 %v573_v44, %v554_v48  ;;  %v577_v56 = vadd.f32 %v576_v51, %v575_v50  ;;  %p1151_p7 = pnand %p1150_p5, %p1144_p2 }
  0xc5   : > { %v558_v57 = vadd.f32 %v557_v52, %v537_v49  ;;  %v597_v58 = vadd.f32 %v596_v54, %v595_v53 }
  0xc6   : > { %v594_v59 = vadd.f32 %v593_v45, %v574_v55 }
  0xc7   : > { %v578_v60 = vadd.f32 %v577_v56, %v558_v57 }
  0xc8   : > { %599 = vst [vmem:[%s477_s8] sm:$0xf] %v594_v59 }
  0xc9   : > { %v598_v61 = vadd.f32 %v597_v58, %v578_v60 }
  0xca   : > { %1154 = shalt.err (!%p1151_p7)
}
  0xcb   : > { %s1155_s18 = scalar_lea.hbm %s1743_s21, 64  ;;  %s1159_s12 = scalar_lea.hbm %s1892_s20, 256 }
  0xcc   : > { %p1156_p13 = scmp.ne.s32.totalorder %s1743_s21, %s1155_s18  ;;  %p1160_p3 = scmp.lt.u32.totalorder %s1743_s21, %s1892_s20 }
  0xcd   : > { %p1161_p9 = scmp.lt.u32.totalorder %s1159_s12, %s1155_s18  ;;  %p1163_p12 = scmp.lt.u32.totalorder %s1155_s18, %s1743_s21 }
  0xce   : > { %p1157_p4 = pnand %p1156_p13, %p1894_p11 }
  0xcf   : > { %p1162_p0 = por %p1161_p9, %p1160_p3 }
  0xd0   : > { %p1158_p10 = pneg %p1157_p4 }
  0xd1   : > { %p1164_p1 = por %p1163_p12, %p1162_p0 }
  0xd3   : > { %p1165_p2 = pnand %p1164_p1, %p1158_p10 }
  0xd5   : > { %1168 = shalt.err (!%p1165_p2)
}
  0xd6   : > { %905 = dma.vmem_to_hbm [thread:$0]  (%p1894_p11), %s1738_s7, 64, %s1743_s21, %s602_s13   ;;  %600 = vst [vmem:[%s484_s11] sm:$0xf] %v598_v61 }
  0xd7   : > { %s607_s1 = scalar_lea.sflag [#allocation12], %s1684_s0  ;;  %s1169_s9 = scalar_lea.vmem %s1745_s27, 64 }
  0xd8   : > { %p1170_p6 = scmp.ne.s32.totalorder %s1745_s27, %s1169_s9  ;;  %s1316_s24 = smov [#allocation11]  }
  0xd9   : > { %s1173_s15 = sshll.u32 %s1316_s24, 4  ;;  %s1174_s15 = int_to_ptr.vmem [resolvable:$false] %s1173_s15 }
  0xda   : > { %p1171_p8 = pnand %p1170_p6, %p1894_p11  ;;  %s1175_s22 = scalar_lea.vmem %s1174_s15, 128 }
  0xdb   : > { %p1176_p7 = scmp.lt.s32.totalorder %s1745_s27, %s1174_s15  ;;  %p1177_p13 = scmp.lt.s32.totalorder %s1175_s22, %s1169_s9 }
  0xdc   : > { %p1172_p5 = pneg %p1171_p8 }
  0xdd   : > { %p1178_p4 = por %p1177_p13, %p1176_p7 }
  0xdf   : > { %p1179_p10 = pnand %p1178_p4, %p1172_p5 }
  0xe1   : > { %1182 = shalt.err (!%p1179_p10)
}
  0xe2   : > { %s1183_s0 = scalar_lea.hbm %s1750_s14, 64  ;;  %s1187_s11 = scalar_lea.hbm %s1893_s16, 256 }
  0xe3   : > { %p1184_p3 = scmp.ne.s32.totalorder %s1750_s14, %s1183_s0  ;;  %p1188_p12 = scmp.lt.u32.totalorder %s1750_s14, %s1893_s16 }
  0xe4   : > { %p1189_p1 = scmp.lt.u32.totalorder %s1187_s11, %s1183_s0  ;;  %p1191_p6 = scmp.lt.u32.totalorder %s1183_s0, %s1750_s14 }
  0xe5   : > { %p1185_p9 = pnand %p1184_p3, %p1894_p11 }
  0xe6   : > { %p1190_p2 = por %p1189_p1, %p1188_p12 }
  0xe7   : > { %p1186_p0 = pneg %p1185_p9 }
  0xe8   : > { %p1192_p8 = por %p1191_p6, %p1190_p2 }
  0xea   : > { %p1193_p5 = pnand %p1192_p8, %p1186_p0 }
  0xec   : > { %1196 = shalt.err (!%p1193_p5)
}
  0xed   : > { %906 = dma.vmem_to_hbm [thread:$0]  (%p1894_p11), %s1745_s27, 64, %s1750_s14, %s607_s1  }
  0xee PF: > { %s1895_s18 = sld [smem:[#allocation21_spill]]  ;;  %s1896_s8 = sld [smem:[#allocation19_spill]] }
  0xef   : > { %s1897_s17 = sld [smem:[#allocation27_spill]] }
  0xf4   : > { %p930_p7 = scmp.ge.s32.totalorder %s1895_s18, 2  ;;  %s649_s12 = sand.u32 1, %s1896_s8  }
  0xf5   : > { %p1898_p13 = scmp.ne.s32.totalorder %s1897_s17, 0  ;;  %s650_s23 = scalar_lea.sflag [#allocation4], %s649_s12 }
  0xf7   : > { %p923_p4 = pnand %p930_p7, %p1898_p13 }
  0xf9   : > { %1258 = dma.done.wait (!%p923_p4), %s650_s23, 64  }
  0xfa   : > { %1260 = vsyncadd (!%p923_p4), %s650_s23, 4294967232  ;;  %s659_s19 = scalar_lea.sflag [#allocation12], %s649_s12 }
  0xfb   : > { %1262 = dma.done.wait (!%p923_p4), %s659_s19, 64  }
  0xfc   : > { %1264 = vsyncadd (!%p923_p4), %s659_s19, 4294967232  ;;  %s33_s11 = sadd.s32 1, %s1895_s18   ;;  %s1899_s30 = sld [smem:[#allocation24_spill]] }
  0xfd   : > { %p30_p10 = scmp.ge.s32.totalorder %s33_s11, 6   ;;  %s1900_s14 = sld [smem:[#allocation25_spill]] }
  0xfe   : > { %s1901_s1 = sld [smem:[#allocation20_spill]]  ;;  %s1902_s9 = sld [smem:[#allocation22_spill]] }
  0xff   : > { %s1903_s15 = sld [smem:[#allocation23_spill]]  ;;  %s1904_s24 = smov %s1271_s25 }
 0x100   : > { %s1905_s25 = smov %s1275_s26  ;;  %s1907_s27 = smov %s1283_s28 }
 0x101   : > { %s1908_s28 = smov %s1287_s29  ;;  %s1911_s8 = smov %s1303_s10 }
 0x102   : > { %s1906_s26 = smov %s1899_s30  ;;  %32 = sbr.rel (!%p30_p10) target bundleno = 20 (0x14), region = 155 }
 0x103   : > { %s1909_s29 = smov %s1900_s14 }
 0x104   : > { %s1910_s30 = smov %s1901_s1 }
 0x105   : > { %s1912_s10 = smov %s1903_s15 }
 0x109   :  { %664 = vsyncpa [#allocation3], 1 }
 0x10a   :  { %666 = vsyncpa [#allocation3 + $0x1], 1 }
 0x10b   :  { %667 = vsyncpa [#allocation6], 1 }
 0x10c   :  { %669 = vsyncpa [#allocation6 + $0x1], 1 }
 0x10d   :  { %670 = vsyncpa [#allocation9], 1 }
 0x10e   :  { %672 = vsyncpa [#allocation9 + $0x1], 1 }
 0x10f   :  { %673 = vsyncpa [#allocation4], 1 }
 0x110   :  { %675 = vsyncpa [#allocation4 + $0x1], 1 }
 0x111   :  { %676 = vsyncpa [#allocation12], 1 }
 0x112   :  { %678 = vsyncpa [#allocation12 + $0x1], 1 }

</bundles_post_ra>
